<compile_context>
chip_gen: v7x
topology: tpu7x:2x2x1
jax: 0.10.0
libtpu: 0.0.40
codegen_flags: <defaults>
</compile_context>

<pallas_src>
import functools

import jax
import jax.numpy as jnp
from jax.experimental import pallas as pl
from jax.experimental.pallas import tpu as pltpu


def _gemma_mlp_kernel(x_ref, wgu_ref, wd_ref, o_ref):
    # x_ref   : (tm, H)      bf16
    # wgu_ref : (H, 2*ti)    bf16   [gate tile | up tile]
    # wd_ref  : (ti, H)      bf16
    # o_ref   : (tm, H)      f32    (VMEM-resident across the reduction axis)
    i = pl.program_id(1)
    ti = wd_ref.shape[0]  # static Python int, multiple of 128

    x = x_ref[...]
    # One MXU matmul produces gate and up together: (tm, 2*ti) in f32.
    gu = jnp.dot(x, wgu_ref[...], preferred_element_type=jnp.float32)
    gate = gu[:, :ti]
    up = gu[:, ti:]
    # F.gelu(..., approximate='tanh') == jax.nn.gelu(..., approximate=True).
    # Elementwise math kept in f32 (v5e has no bf16 VPU/EUP datapath).
    fused = jax.nn.gelu(gate, approximate=True) * up
    down = jnp.dot(fused.astype(wd_ref.dtype), wd_ref[...],
                   preferred_element_type=jnp.float32)

    @pl.when(i == 0)
    def _():
        o_ref[...] = down

    @pl.when(i > 0)
    def _():
        o_ref[...] += down


def prepare_gemma_mlp_weights(gate_w, up_w, down_w, *, ti=512,
                              weight_dtype=jnp.bfloat16):
    """One-time (outside the hot path) weight prep.

    gate_w, up_w : (intermediate, hidden)  -- PyTorch nn.Linear layout
    down_w       : (hidden, intermediate)

    Returns (wgu, wd_t) with gate/up transposed, cast to `weight_dtype`, and
    interleaved per `ti`-wide block so each reduction step reads one
    contiguous (hidden, 2*ti) tile = [gate tile i | up tile i].
    """
    inter, hidden = gate_w.shape
    ti = min(ti, inter)
    assert inter % ti == 0, "intermediate size must divide ti"
    assert ti % 128 == 0, "ti must be a multiple of 128 (lane width)"

    wg_t = gate_w.T.astype(weight_dtype)          # (H, I)
    wu_t = up_w.T.astype(weight_dtype)            # (H, I)
    wgu = jnp.stack(
        [wg_t.reshape(hidden, inter // ti, ti),
         wu_t.reshape(hidden, inter // ti, ti)],
        axis=2,
    ).reshape(hidden, 2 * inter)                  # [g0|u0|g1|u1|...]
    wd_t = down_w.T.astype(weight_dtype)          # (I, H)
    return wgu, wd_t


def _vmem_footprint_bytes(tm, ti, hidden):
    bf16, f32, n_buf = 2, 4, 2
    x_tile = tm * hidden * bf16
    wgu_tile = hidden * 2 * ti * bf16
    wd_tile = ti * hidden * bf16
    o_tile = tm * hidden * f32
    return n_buf * (x_tile + wgu_tile + wd_tile + o_tile)


@functools.partial(jax.jit, static_argnames=("ti", "tm"))
def gemma_mlp_forward(x, wgu, wd_t, *, ti, tm=256):
    """Pallas equivalent of GemmaMLP.forward.

    x    : (batch, seq, hidden)
    wgu  : (hidden, 2*intermediate)  bf16, from prepare_gemma_mlp_weights
    wd_t : (intermediate, hidden)    bf16
    """
    batch, seq, hidden = x.shape
    inter = wd_t.shape[0]
    n = batch * seq

    tm = min(tm, n)
    assert n % tm == 0, "token count must divide the row tile"
    assert inter % ti == 0, "intermediate size must divide the reduction tile"

    # bf16 activations for the MXU; accumulation stays f32 inside the kernel.
    x2 = x.reshape(n, hidden).astype(jnp.bfloat16)

    vmem_limit = min(_vmem_footprint_bytes(tm, ti, hidden) + (4 << 20), 56 << 20)

    out_flat = pl.pallas_call(
        _gemma_mlp_kernel,
        out_shape=jax.ShapeDtypeStruct((n, hidden), jnp.float32),
        grid_spec=pltpu.PrefetchScalarGridSpec(
            num_scalar_prefetch=0,
            grid=(n // tm, inter // ti),
            in_specs=[
                pl.BlockSpec((tm, hidden), lambda m, i: (m, 0)),       # x tile
                pl.BlockSpec((hidden, 2 * ti), lambda m, i: (0, i)),   # [gate|up] tile
                pl.BlockSpec((ti, hidden), lambda m, i: (i, 0)),       # down tile
            ],
            out_specs=pl.BlockSpec((tm, hidden), lambda m, i: (m, 0)),
        ),
        compiler_params=pltpu.CompilerParams(
            dimension_semantics=("parallel", "arbitrary"),
            vmem_limit_bytes=int(vmem_limit)),
    )(x2, wgu, wd_t)

    # TODO(synk): for v7x decode (n // tm == 1) add a second parallel split of
    # the reduction axis with partial-sum outputs so both TensorCores stream.
    return out_flat.reshape(batch, seq, hidden).astype(x.dtype)


if __name__ == "__main__":
    # Small synthetic shapes consistent with the module's forward
    # (scaled-down Gemma: hidden=256, intermediate=1024).
    batch, seq = 2, 8
    hidden = 256
    intermediate = 1024
    ti = 512

    key = jax.random.PRNGKey(0)
    k_x, k_g, k_u, k_d = jax.random.split(key, 4)

    x = jax.random.normal(k_x, (batch, seq, hidden), dtype=jnp.float32)
    # nn.Linear weight layout: (out_features, in_features), bias=False.
    gate_w = jax.random.normal(k_g, (intermediate, hidden), dtype=jnp.float32) * 0.02
    up_w = jax.random.normal(k_u, (intermediate, hidden), dtype=jnp.float32) * 0.02
    down_w = jax.random.normal(k_d, (hidden, intermediate), dtype=jnp.float32) * 0.02

    # One-time weight prep (outside the jitted hot path).
    wgu, wd_t = prepare_gemma_mlp_weights(gate_w, up_w, down_w, ti=ti)

    out = gemma_mlp_forward(x, wgu, wd_t, ti=ti, tm=256)
    out = jax.block_until_ready(out)

    # Reference mirroring the kernel's dtype policy (bf16 operands, f32 accum,
    # f32 gelu), so only the blocked reduction order differs.
    xb = x.reshape(batch * seq, hidden).astype(jnp.bfloat16)
    wg_b = gate_w.T.astype(jnp.bfloat16)
    wu_b = up_w.T.astype(jnp.bfloat16)
    wd_b = down_w.T.astype(jnp.bfloat16)
    gate_ref = jnp.dot(xb, wg_b, preferred_element_type=jnp.float32)
    up_ref = jnp.dot(xb, wu_b, preferred_element_type=jnp.float32)
    fused_ref = (jax.nn.gelu(gate_ref, approximate=True) * up_ref).astype(jnp.bfloat16)
    ref = jnp.dot(fused_ref, wd_b,
                  preferred_element_type=jnp.float32).reshape(batch, seq, hidden)

    # Full-precision reference of the original PyTorch math (loose check).
    x2 = x.reshape(batch * seq, hidden)
    ref_f32 = ((jax.nn.gelu(x2 @ gate_w.T, approximate=True) * (x2 @ up_w.T))
               @ down_w.T).reshape(batch, seq, hidden)

    assert out.shape == (batch, seq, hidden)
    assert out.dtype == jnp.float32
    assert bool(jnp.allclose(out, ref, rtol=2e-3, atol=2e-3)), \
        "mismatch vs bf16-matched reference"
    assert bool(jnp.allclose(out, ref_f32, rtol=5e-2, atol=5e-3)), \
        "mismatch vs f32 reference"

    print("KERNEL_OK")
</pallas_src>

<mosaic_0001>
module attributes {stable_mosaic.version = 11 : i64} {
  func.func @_gemma_mlp_kernel(%arg0: i32, %arg1: i32, %arg2: memref<16x256xbf16, #tpu.memory_space<vmem>>, %arg3: memref<256x1024xbf16, #tpu.memory_space<vmem>>, %arg4: memref<512x256xbf16, #tpu.memory_space<vmem>>, %arg5: memref<16x256xf32, #tpu.memory_space<vmem>>) attributes {dimension_semantics = [#tpu.dimension_semantics<parallel>, #tpu.dimension_semantics<arbitrary>], iteration_bounds = array<i64: 1, 2>, scalar_prefetch = 0 : i64, scratch_operands = 0 : i64, tpu.core_type = #tpu.core_type<tc>, window_params = [{transform_indices = @transform_0, window_bounds = array<i64: 16, 256>}, {transform_indices = @transform_1, window_bounds = array<i64: 256, 1024>}, {transform_indices = @transform_2, window_bounds = array<i64: 512, 256>}, {transform_indices = @transform_3, window_bounds = array<i64: 16, 256>}]} {
    %c0 = arith.constant 0 : index
    %c0_0 = arith.constant 0 : index
    %0 = vector.load %arg2[%c0, %c0_0] : memref<16x256xbf16, #tpu.memory_space<vmem>>, vector<16x256xbf16>
    %c0_1 = arith.constant 0 : index
    %c0_2 = arith.constant 0 : index
    %1 = vector.load %arg3[%c0_1, %c0_2] : memref<256x1024xbf16, #tpu.memory_space<vmem>>, vector<256x1024xbf16>
    %cst = arith.constant dense<0.000000e+00> : vector<16x1024xf32>
    %2 = tpu.matmul %0, %1, %cst {dimension_numbers = #tpu.dot_dimension_numbers<[1], [0], [0], [1], [0, 0, 1, 1], [], []>} : vector<16x256xbf16>, vector<256x1024xbf16>, vector<16x1024xf32> -> vector<16x1024xf32>
    %3 = vector.extract_strided_slice %2 {offsets = [0, 0], sizes = [16, 512], strides = [1, 1]} : vector<16x1024xf32> to vector<16x512xf32>
    %4 = vector.extract_strided_slice %2 {offsets = [0, 512], sizes = [16, 512], strides = [1, 1]} : vector<16x1024xf32> to vector<16x512xf32>
    %5 = arith.mulf %3, %3 : vector<16x512xf32>
    %6 = arith.mulf %3, %5 : vector<16x512xf32>
    %cst_3 = arith.constant 4.471500e-02 : f32
    %7 = vector.broadcast %cst_3 : f32 to vector<16x512xf32>
    %8 = arith.mulf %7, %6 : vector<16x512xf32>
    %9 = arith.addf %3, %8 : vector<16x512xf32>
    %cst_4 = arith.constant 0.797884583 : f32
    %10 = vector.broadcast %cst_4 : f32 to vector<16x512xf32>
    %11 = arith.mulf %10, %9 : vector<16x512xf32>
    %12 = math.tanh %11 : vector<16x512xf32>
    %cst_5 = arith.constant 1.000000e+00 : f32
    %13 = vector.broadcast %cst_5 : f32 to vector<16x512xf32>
    %14 = arith.addf %13, %12 : vector<16x512xf32>
    %cst_6 = arith.constant 5.000000e-01 : f32
    %15 = vector.broadcast %cst_6 : f32 to vector<16x512xf32>
    %16 = arith.mulf %15, %14 : vector<16x512xf32>
    %17 = arith.mulf %3, %16 : vector<16x512xf32>
    %18 = arith.mulf %17, %4 : vector<16x512xf32>
    %19 = arith.truncf %18 : vector<16x512xf32> to vector<16x512xbf16>
    %c0_7 = arith.constant 0 : index
    %c0_8 = arith.constant 0 : index
    %20 = vector.load %arg4[%c0_7, %c0_8] : memref<512x256xbf16, #tpu.memory_space<vmem>>, vector<512x256xbf16>
    %cst_9 = arith.constant dense<0.000000e+00> : vector<16x256xf32>
    %21 = tpu.matmul %19, %20, %cst_9 {dimension_numbers = #tpu.dot_dimension_numbers<[1], [0], [0], [1], [0, 0, 1, 1], [], []>} : vector<16x512xbf16>, vector<512x256xbf16>, vector<16x256xf32> -> vector<16x256xf32>
    %c0_i32 = arith.constant 0 : i32
    %22 = arith.cmpi eq, %arg1, %c0_i32 : i32
    %23 = arith.extui %22 : i1 to i32
    %c0_i32_10 = arith.constant 0 : i32
    %24 = arith.cmpi ne, %23, %c0_i32_10 : i32
    scf.if %24 {
      %c0_13 = arith.constant 0 : index
      %c0_14 = arith.constant 0 : index
      %28 = vector.load %arg5[%c0_13, %c0_14] : memref<16x256xf32, #tpu.memory_space<vmem>>, vector<16x256xf32>
      tpu.vector_store %arg5[%c0_13, %c0_14], %21 {strides = array<i32>} : memref<16x256xf32, #tpu.memory_space<vmem>>, vector<16x256xf32>,
    } else {
    }
    %c0_i32_11 = arith.constant 0 : i32
    %25 = arith.cmpi sgt, %arg1, %c0_i32_11 : i32
    %26 = arith.extui %25 : i1 to i32
    %c0_i32_12 = arith.constant 0 : i32
    %27 = arith.cmpi ne, %26, %c0_i32_12 : i32
    scf.if %27 {
      %c0_13 = arith.constant 0 : index
      %c0_14 = arith.constant 0 : index
      %28 = vector.load %arg5[%c0_13, %c0_14] : memref<16x256xf32, #tpu.memory_space<vmem>>, vector<16x256xf32>
      %29 = arith.addf %28, %21 : vector<16x256xf32>
      %c0_15 = arith.constant 0 : index
      %c0_16 = arith.constant 0 : index
      %30 = vector.load %arg5[%c0_15, %c0_16] : memref<16x256xf32, #tpu.memory_space<vmem>>, vector<16x256xf32>
      tpu.vector_store %arg5[%c0_15, %c0_16], %29 {strides = array<i32>} : memref<16x256xf32, #tpu.memory_space<vmem>>, vector<16x256xf32>,
    } else {
    }
    return
  }
  func.func @transform_0(%arg0: i32, %arg1: i32) -> (i32, i32) {
    %c0_i32 = arith.constant 0 : i32
    %c0_i32_0 = arith.constant 0 : i32
    return %arg0, %c0_i32 : i32, i32
  }
  func.func @transform_1(%arg0: i32, %arg1: i32) -> (i32, i32) {
    %c0_i32 = arith.constant 0 : i32
    %c0_i32_0 = arith.constant 0 : i32
    return %c0_i32, %arg1 : i32, i32
  }
  func.func @transform_2(%arg0: i32, %arg1: i32) -> (i32, i32) {
    %c0_i32 = arith.constant 0 : i32
    %c0_i32_0 = arith.constant 0 : i32
    return %arg1, %c0_i32 : i32, i32
  }
  func.func @transform_3(%arg0: i32, %arg1: i32) -> (i32, i32) {
    %c0_i32 = arith.constant 0 : i32
    %c0_i32_0 = arith.constant 0 : i32
    return %arg0, %c0_i32 : i32, i32
  }
}

</mosaic_0001>

<bundles_post_ra>
// kernel: gemma_mlp_forward.1
= control target key start
LH: loop header
LB: loop body
LE: loop exit
PB: predicated region body
PF: predicated region fallthrough
CT: control target
= control target key end

     0   :  { %8 = vsyncpa [#allocation3], 0  ;;  %s2934_s0 = inlined_call_operand.vmem [shape: bf16[16,256], index: 0, kind: input, shape index: {}]   ;;  %s2935_s1 = inlined_call_operand.hbm [shape: bf16[256,2048], index: 1, kind: input, shape index: {}]   ;;  %s2936_s2 = inlined_call_operand.hbm [shape: bf16[1024,256], index: 2, kind: input, shape index: {}]   ;;  %s2937_s3 = inlined_call_operand.hbm [shape: f32[16,256], index: 3, kind: output, shape index: {}]  }
   0x1   :  { %10 = vsyncpa [#allocation3 + $0x1], 0 }
   0x2   :  { %11 = vsyncpa [#allocation6], 0 }
   0x3   :  { %13 = vsyncpa [#allocation6 + $0x1], 0 }
   0x4   :  { %14 = vsyncpa [#allocation4], 0  ;;  %s2491_s12 = smov 0   ;;  %s2493_s13 = smov 0  }
   0x5   :  { %s2495_s14 = smov 0   ;;  %s2497_s15 = smov 0  }
   0x6   :  { %s2499_s16 = smov 0   ;;  %s2501_s17 = smov 0  }
   0x7 LB: > { %s1905_s18 = sadd.s32 4294967295, %s2459_s17   ;;  %s29_s19 = sadd.s32 1, %s2455_s16  ;;  %s2459_s17 = sphi %s2501_s17, %s20_s17   ;;  %s2455_s16 = sphi %s2499_s16, %s2950_s16   ;;  %s2451_s15 = sphi %s2497_s15, %s2949_s15   ;;  %s2447_s14 = sphi %s2495_s14, %s2948_s14   ;;  %s2443_s13 = sphi %s2493_s13, %s2947_s13   ;;  %s2439_s12 = sphi %s2491_s12, %s2946_s12  }
   0x8   : > { %p30_p0 = scmp.ge.s32.totalorder %s29_s19, 2  ;;  %s65_s20 = sadd.s32 1, %s2447_s14 }
   0x9   : > { %p72_p1 = scmp.ne.s32.totalorder %s2447_s14, %s2443_s13  ;;  %p73_p2 = scmp.eq.s32.totalorder %s2459_s17, 0 }
   0xa   : > { %s2952_s19 = smov (%p30_p0, %s29_s19), 0  ;;  %p78_p4 = scmp.ne.s32.totalorder %s2443_s13, %s2439_s12 }
   0xb   : > { %p2527_p3 = por %p73_p2, %p72_p1  ;;  %s62_s22 = ssub.s32 %s2455_s16, %s2952_s19 }
   0xc   : > { %p79_p5 = scmp.eq.s32.totalorder %s1905_s18, 0  ;;  %p63_p6 = scmp.eq.s32.totalorder %s62_s22, 0 }
   0xd   : > { %p2141_p8 = scmp.lt.s32.totalorder %s2459_s17, 2  ;;  %s2545_s25 = sand.u32 1, %s2447_s14  }
   0xe   : > { %p2536_p7 = por %p79_p5, %p78_p4  ;;  %s2119_s26 = sshll.u32 %s2455_s16, 9 }
   0xf   : > { %s2542_s24 = scalar_select %p63_p6, %s2447_s14, %s65_s20  }
  0x10   : > { %s2940_s23 = scalar_select %p2536_p7, 1, 0 }
  0x11   : > { %s1909_s27 = sshll.u32 %s2545_s25, 10  ;;  %s2552_s30 = scalar_lea.hbm %s2935_s1, %s2119_s26 }
  0x12   : > { %s168_s4 = scalar_lea.vmem [#allocation2], %s1909_s27  ;;  %p2556_p9 = pnand %p2141_p8, %p2527_p3 }
  0x13   : > { %s175_s5 = sshll.u32 %s168_s4, 4  ;;  %s165_s7 = scalar_lea.sflag [#allocation3], %s2545_s25  ;;  %s2560_s5 = int_to_ptr.vmem [resolvable:$true] %s175_s5 }
  0x14   : > { %s2315_s8 = scalar_lea.hbm %s2552_s30, 16384  ;;  %p2317_p12 = pneg %p2556_p9 }
  0x15   : > { %p2316_p11 = scmp.ne.s32.totalorder %s2552_s30, %s2315_s8  ;;  %s2320_s11 = scalar_lea.hbm %s2935_s1, 32768 }
  0x16   : > { %p2321_p1 = scmp.lt.u32.totalorder %s2552_s30, %s2935_s1  ;;  %p2322_p2 = scmp.lt.u32.totalorder %s2320_s11, %s2315_s8 }
  0x17   : > { %p2318_p13 = pnand %p2317_p12, %p2316_p11  ;;  %p2324_p4 = scmp.lt.u32.totalorder %s2315_s8, %s2552_s30 }
  0x18   : > { %p2323_p3 = por %p2322_p2, %p2321_p1 }
  0x19   : > { %p2319_p0 = pneg %p2318_p13 }
  0x1a   : > { %p2325_p5 = por %p2324_p4, %p2323_p3 }
  0x1c   : > { %p2326_p6 = pnand %p2325_p5, %p2319_p0 }
  0x1e   : > { %2329 = shalt.err (!%p2326_p6)
}
  0x1f   : > { %s2330_s21 = scalar_lea.vmem %s2560_s5, 16384  ;;  %s2461_s22 = smov [#allocation2]  }
  0x20   : > { %p2331_p8 = scmp.ne.s32.totalorder %s2560_s5, %s2330_s21  ;;  %s2335_s26 = sshll.u32 %s2461_s22, 4  ;;  %s2336_s26 = int_to_ptr.vmem [resolvable:$false] %s2335_s26 }
  0x21   : > { %s2337_s27 = scalar_lea.vmem %s2336_s26, 32768  ;;  %p2338_p10 = scmp.lt.s32.totalorder %s2560_s5, %s2336_s26 }
  0x22   : > { %p2333_p11 = pnand %p2331_p8, %p2317_p12  ;;  %p2339_p1 = scmp.lt.s32.totalorder %s2337_s27, %s2330_s21 }
  0x24   : > { %p2334_p13 = pneg %p2333_p11  ;;  %p2340_p2 = por %p2339_p1, %p2338_p10 }
  0x26   : > { %p2341_p3 = pnand %p2340_p2, %p2334_p13 }
  0x28   : > { %2344 = shalt.err (!%p2341_p3)
}
  0x29   : > { %s2462_s28 = smov 1024   ;;  %s2463_s29 = smov 512  }
  0x2a   : > { %s2464_s4 = smov 32   ;;  %p205_p0 = scmp.lt.s32.totalorder %s2459_s17, 3 }
  0x2b   : > { %2137 = dma.hbm_to_vmem [thread:$0]  (!%p2556_p9), %s2552_s30, 16384, %s2560_s5, %s165_s7, %s2462_s28, %s2463_s29, %s2464_s4  }
  0x2c   : > { %s1912_s8 = sshll.u32 %s2545_s25, 9  ;;  %s2121_s9 = sshll.u32 %s2455_s16, 13 }
  0x2d   : > { %p2942_p10 = scmp.ge.s32.totalorder %s2459_s17, 1  ;;  %s2603_s20 = scalar_lea.hbm %s2936_s2, %s2121_s9 }
  0x2e   : > { %s189_s21 = scalar_lea.vmem [#allocation5], %s1912_s8  ;;  %s186_s30 = scalar_lea.sflag [#allocation6], %s2545_s25 }
  0x2f   : > { %p2596_p4 = pnand %p2942_p10, %p205_p0  ;;  %s197_s22 = sshll.u32 %s189_s21, 4  ;;  %s2605_s22 = int_to_ptr.vmem [resolvable:$true] %s197_s22 }
  0x30   : > { %s2345_s5 = scalar_lea.hbm %s2603_s20, 8192  ;;  %s2350_s27 = scalar_lea.hbm %s2936_s2, 16384 }
  0x31   : > { %p2346_p5 = scmp.ne.s32.totalorder %s2603_s20, %s2345_s5  ;;  %p2351_p11 = scmp.lt.u32.totalorder %s2603_s20, %s2936_s2 }
  0x32   : > { %p2352_p13 = scmp.lt.u32.totalorder %s2350_s27, %s2345_s5  ;;  %p2354_p2 = scmp.lt.u32.totalorder %s2345_s5, %s2603_s20 }
  0x33   : > { %p2348_p6 = pnand %p2346_p5, %p2317_p12 }
  0x34   : > { %p2353_p1 = por %p2352_p13, %p2351_p11 }
  0x35   : > { %p2349_p8 = pneg %p2348_p6 }
  0x36   : > { %p2355_p3 = por %p2354_p2, %p2353_p1 }
  0x38   : > { %p2356_p0 = pnand %p2355_p3, %p2349_p8 }
  0x3a   : > { %2359 = shalt.err (!%p2356_p0)
}
  0x3b   : > { %s2360_s4 = scalar_lea.vmem %s2605_s22, 8192  ;;  %s2465_s8 = smov [#allocation5]  }
  0x3c   : > { %p2361_p10 = scmp.ne.s32.totalorder %s2605_s22, %s2360_s4  ;;  %s2365_s9 = sshll.u32 %s2465_s8, 4  ;;  %s2366_s9 = int_to_ptr.vmem [resolvable:$false] %s2365_s9 }
  0x3d   : > { %s2367_s11 = scalar_lea.vmem %s2366_s9, 16384  ;;  %p2368_p7 = scmp.lt.s32.totalorder %s2605_s22, %s2366_s9 }
  0x3e   : > { %p2363_p5 = pnand %p2361_p10, %p2317_p12  ;;  %p2369_p11 = scmp.lt.s32.totalorder %s2367_s11, %s2360_s4 }
  0x40   : > { %p2364_p6 = pneg %p2363_p5  ;;  %p2370_p13 = por %p2369_p11, %p2368_p7 }
  0x42   : > { %p2371_p1 = pnand %p2370_p13, %p2364_p6 }
  0x44   : > { %2374 = shalt.err (!%p2371_p1)
}
  0x45   : > { %s2466_s12 = smov 128   ;;  %s2467_s21 = smov 8  }
  0x46   : > { %2140 = dma.hbm_to_vmem [thread:$0]  (!%p2556_p9), %s2603_s20, 8192, %s2605_s22, %s186_s30, %s2466_s12, %s2466_s12, %s2467_s21  }
  0x47   : > { %209 = sbr.rel (%p2596_p4) target bundleno = 750 (0x2ee), region = 32  ;;  %s211_s5 = sand.u32 (!%p2596_p4), 1, %s2443_s13  }
  0x48   : > { %s1917_s7 = sshll.u32 (!%p2596_p4), %s211_s5, 10  ;;  %s212_s26 = scalar_lea.sflag (!%p2596_p4), [#allocation3], %s211_s5 }
  0x49   : > { %s2636_s27 = scalar_lea.vmem (!%p2596_p4), [#allocation2], %s1917_s7  ;;  %p2944_p7 = scmp.ne.s32.totalorder (!%p2596_p4), %s2940_s23, 0 }
  0x4e   : > { %2426 = dma.done.wait (%p2944_p7), %s212_s26, 16384  }
  0x4f   : > { %2428 = vsyncadd (%p2944_p7), %s212_s26, 4294950912  ;;  %s1918_s28 = sshll.u32 %s211_s5, 9  ;;  %s221_s6 = scalar_lea.sflag [#allocation6], %s211_s5 }
  0x50   : > { %s2642_s25 = scalar_lea.vmem [#allocation5], %s1918_s28 }
  0x51   : > { %2430 = dma.done.wait (%p2944_p7), %s221_s6, 8192  }
  0x52   : > { %2432 = vsyncadd (%p2944_p7), %s221_s6, 4294959104  ;;  %v265_v0 = vld [vmem:[%s2636_s27] sm:$0xff]  ;;  %v267_v10 = vld [vmem:[%s2636_s27 + $0x10] sm:$0xff]  ;;  %p2113_p9 = scmp.ne.s32.totalorder %s2451_s15, 0 }
  0x53   : > { %v269_v1 = vld [vmem:[%s2636_s27 + $0x20] sm:$0xff]  ;;  %v271_v13 = vld [vmem:[%s2636_s27 + $0x30] sm:$0xff] }
  0x54   : > { %v273_v2 = vld [vmem:[%s2636_s27 + $0x40] sm:$0xff]  ;;  %v1922_v3 = vcombine.high %v265_v0, %v269_v1  ;;  %v1921_v4 = vcombine.low %v265_v0, %v269_v1  ;;  %v1926_v15 = vcombine.high %v267_v10, %v271_v13  ;;  %v1925_v16 = vcombine.low %v267_v10, %v271_v13  ;;  %v275_v17 = vld [vmem:[%s2636_s27 + $0x50] sm:$0xff] }
  0x55   : > { %v277_v5 = vld [vmem:[%s2636_s27 + $0x60] sm:$0xff]  ;;  %v279_v18 = vld [vmem:[%s2636_s27 + $0x70] sm:$0xff] }
  0x56   : > { %v1930_v6 = vcombine.high %v273_v2, %v277_v5  ;;  %v281_v7 = vld [vmem:[%s2636_s27 + $0x80] sm:$0xff]  ;;  %1043 = vmatprep.subr.bf16.mxu1 %v1922_v3  ;;  %v1929_v9 = vcombine.low %v273_v2, %v277_v5  ;;  %v1934_v19 = vcombine.high %v275_v17, %v279_v18  ;;  %v283_v20 = vld [vmem:[%s2636_s27 + $0x90] sm:$0xff]  ;;  %1129 = vmatprep.subr.bf16.mxu0 %v1926_v15 }
  0x57   : > { %v285_v8 = vld [vmem:[%s2636_s27 + $0xa0] sm:$0xff]  ;;  %1044 = vmatpush1.bf16.msra.mxu1 %v1921_v4  ;;  %v287_v21 = vld [vmem:[%s2636_s27 + $0xb0] sm:$0xff]  ;;  %1130 = vmatpush1.bf16.msra.mxu0 %v1925_v16  ;;  %v1933_v24 = vcombine.low %v275_v17, %v279_v18 }
  0x58   : > { %1045 = vmatprep.subr.bf16.mxu1 %v1930_v6  ;;  %v1938_v11 = vcombine.high %v281_v7, %v285_v8  ;;  %v289_v12 = vld [vmem:[%s2636_s27 + $0xc0] sm:$0xff]  ;;  %v1937_v22 = vcombine.low %v281_v7, %v285_v8  ;;  %1131 = vmatprep.subr.bf16.mxu0 %v1934_v19  ;;  %v1942_v27 = vcombine.high %v283_v20, %v287_v21  ;;  %v291_v28 = vld [vmem:[%s2636_s27 + $0xd0] sm:$0xff] }
  0x59   : > { %v293_v14 = vld [vmem:[%s2636_s27 + $0xe0] sm:$0xff]  ;;  %v295_v29 = vld [vmem:[%s2636_s27 + $0xf0] sm:$0xff]  ;;  %v1941_v32 = vcombine.low %v283_v20, %v287_v21 }
  0x5a   : > { %v1946_v23 = vcombine.high %v289_v12, %v293_v14  ;;  %v297_v25 = vld [vmem:[%s2636_s27 + $0x100] sm:$0xff]  ;;  %v1945_v30 = vcombine.low %v289_v12, %v293_v14  ;;  %v1950_v35 = vcombine.high %v291_v28, %v295_v29  ;;  %v299_v36 = vld [vmem:[%s2636_s27 + $0x110] sm:$0xff]  ;;  %v1949_v40 = vcombine.low %v291_v28, %v295_v29 }
  0x5b   : > { %1046 = vmatpush1.bf16.msra.mxu1 %v1929_v9  ;;  %v301_v26 = vld [vmem:[%s2636_s27 + $0x120] sm:$0xff]  ;;  %1132 = vmatpush1.bf16.msra.mxu0 %v1933_v24  ;;  %v303_v37 = vld [vmem:[%s2636_s27 + $0x130] sm:$0xff] }
  0x5c   : > { %1047 = vmatprep.subr.bf16.mxu1 %v1938_v11  ;;  %v1954_v31 = vcombine.high %v297_v25, %v301_v26  ;;  %v305_v33 = vld [vmem:[%s2636_s27 + $0x140] sm:$0xff]  ;;  %1133 = vmatprep.subr.bf16.mxu0 %v1942_v27  ;;  %v1953_v38 = vcombine.low %v297_v25, %v301_v26  ;;  %v1958_v44 = vcombine.high %v299_v36, %v303_v37  ;;  %v307_v45 = vld [vmem:[%s2636_s27 + $0x150] sm:$0xff] }
  0x5d   : > { %v309_v34 = vld [vmem:[%s2636_s27 + $0x160] sm:$0xff]  ;;  %v311_v46 = vld [vmem:[%s2636_s27 + $0x170] sm:$0xff]  ;;  %v1957_v49 = vcombine.low %v299_v36, %v303_v37 }
  0x5e   : > { %v1962_v39 = vcombine.high %v305_v33, %v309_v34  ;;  %v2673_v41 = vld [vmem:[%s2934_s0 + $0x4] ss:$8 sps:$4 sm:$0xff]   ;;  %v1961_v47 = vcombine.low %v305_v33, %v309_v34  ;;  %v1966_v52 = vcombine.high %v307_v45, %v311_v46  ;;  %v315_v53 = vld [vmem:[%s2636_s27 + $0x190] sm:$0xff]  ;;  %v1965_v57 = vcombine.low %v307_v45, %v311_v46 }
  0x5f   : > { %1048 = vmatpush1.bf16.msra.mxu1 %v1937_v22  ;;  %1134 = vmatpush1.bf16.msra.mxu0 %v1941_v32  ;;  %v313_v42 = vld [vmem:[%s2636_s27 + $0x180] sm:$0xff]  ;;  %v319_v54 = vld [vmem:[%s2636_s27 + $0x1b0] sm:$0xff] }
  0x60   : > { %1049 = vmatprep.subr.bf16.mxu1 %v1946_v23  ;;  %v317_v43 = vld [vmem:[%s2636_s27 + $0x1a0] sm:$0xff]  ;;  %1135 = vmatprep.subr.bf16.mxu0 %v1950_v35  ;;  %v1974_v60 = vcombine.high %v315_v53, %v319_v54  ;;  %v323_v61 = vld [vmem:[%s2636_s27 + $0x1d0] sm:$0xff]  ;;  %v1973_v1 = vcombine.low %v315_v53, %v319_v54 }
  0x61   : > { %1075 = vmatprep.mubr.bf16.mxu1 %v2673_v41  ;;  %1161 = vmatprep.mubr.bf16.mxu0 %v2673_v41  ;;  %v1970_v48 = vcombine.high %v313_v42, %v317_v43  ;;  %v321_v50 = vld [vmem:[%s2636_s27 + $0x1c0] sm:$0xff]  ;;  %v1969_v55 = vcombine.low %v313_v42, %v317_v43  ;;  %v327_v62 = vld [vmem:[%s2636_s27 + $0x1f0] sm:$0xff] }
  0x62   : > { %v325_v51 = vld [vmem:[%s2636_s27 + $0x1e0] sm:$0xff]  ;;  %v1982_v4 = vcombine.high %v323_v61, %v327_v62  ;;  %v331_v5 = vld [vmem:[%s2636_s27 + $0x210] sm:$0xff]  ;;  %v1981_v9 = vcombine.low %v323_v61, %v327_v62 }
  0x63   : > { %1050 = vmatpush1.bf16.msra.mxu1 %v1945_v30  ;;  %1136 = vmatpush1.bf16.msra.mxu0 %v1949_v40  ;;  %v1978_v56 = vcombine.high %v321_v50, %v325_v51  ;;  %v329_v58 = vld [vmem:[%s2636_s27 + $0x200] sm:$0xff]  ;;  %v1977_v63 = vcombine.low %v321_v50, %v325_v51  ;;  %v335_v6 = vld [vmem:[%s2636_s27 + $0x230] sm:$0xff] }
  0x64   : > { %1051 = vmatprep.subr.bf16.mxu1 %v1954_v31  ;;  %1137 = vmatprep.subr.bf16.mxu0 %v1958_v44  ;;  %v333_v59 = vld [vmem:[%s2636_s27 + $0x220] sm:$0xff]  ;;  %v1990_v12 = vcombine.high %v331_v5, %v335_v6  ;;  %v339_v13 = vld [vmem:[%s2636_s27 + $0x250] sm:$0xff]  ;;  %v1989_v17 = vcombine.low %v331_v5, %v335_v6 }
  0x65   : > { %v1986_v0 = vcombine.high %v329_v58, %v333_v59  ;;  %v337_v2 = vld [vmem:[%s2636_s27 + $0x240] sm:$0xff]  ;;  %v1985_v7 = vcombine.low %v329_v58, %v333_v59  ;;  %v343_v14 = vld [vmem:[%s2636_s27 + $0x270] sm:$0xff]  ;;  %v270_v58 = vld [vmem:[%s2636_s27 + $0x28] sm:$0xff] }
  0x66   : > { %v341_v3 = vld [vmem:[%s2636_s27 + $0x260] sm:$0xff]  ;;  %v1998_v20 = vcombine.high %v339_v13, %v343_v14  ;;  %v347_v21 = vld [vmem:[%s2636_s27 + $0x290] sm:$0xff]  ;;  %v1997_v27 = vcombine.low %v339_v13, %v343_v14 }
  0x67   : > { %1052 = vmatpush1.bf16.msra.mxu1 %v1953_v38  ;;  %1138 = vmatpush1.bf16.msra.mxu0 %v1957_v49  ;;  %v1994_v8 = vcombine.high %v337_v2, %v341_v3  ;;  %v345_v10 = vld [vmem:[%s2636_s27 + $0x280] sm:$0xff]  ;;  %v1993_v15 = vcombine.low %v337_v2, %v341_v3  ;;  %v351_v22 = vld [vmem:[%s2636_s27 + $0x2b0] sm:$0xff]  ;;  %v278_v2 = vld [vmem:[%s2636_s27 + $0x68] sm:$0xff] }
  0x68   : > { %1053 = vmatprep.subr.bf16.mxu1 %v1962_v39  ;;  %1139 = vmatprep.subr.bf16.mxu0 %v1966_v52  ;;  %v349_v11 = vld [vmem:[%s2636_s27 + $0x2a0] sm:$0xff]  ;;  %v355_v28 = vld [vmem:[%s2636_s27 + $0x2d0] sm:$0xff]  ;;  %v2006_v30 = vcombine.high %v347_v21, %v351_v22  ;;  %v2005_v35 = vcombine.low %v347_v21, %v351_v22  ;;  %v298_v22 = vld [vmem:[%s2636_s27 + $0x108] sm:$0xff] }
  0x69   : > { %v2002_v16 = vcombine.high %v345_v10, %v349_v11  ;;  %v353_v18 = vld [vmem:[%s2636_s27 + $0x2c0] sm:$0xff]  ;;  %v2001_v23 = vcombine.low %v345_v10, %v349_v11  ;;  %v359_v29 = vld [vmem:[%s2636_s27 + $0x2f0] sm:$0xff]  ;;  %v282_v10 = vld [vmem:[%s2636_s27 + $0x88] sm:$0xff] }
  0x6a   : > { %v357_v19 = vld [vmem:[%s2636_s27 + $0x2e0] sm:$0xff]  ;;  %v363_v36 = vld [vmem:[%s2636_s27 + $0x310] sm:$0xff]  ;;  %v2014_v38 = vcombine.high %v355_v28, %v359_v29  ;;  %v2013_v44 = vcombine.low %v355_v28, %v359_v29  ;;  %v286_v11 = vld [vmem:[%s2636_s27 + $0xa8] sm:$0xff] }
  0x6b   : > { %1054 = vmatpush1.bf16.msra.mxu1 %v1961_v47  ;;  %1140 = vmatpush1.bf16.msra.mxu0 %v1965_v57  ;;  %v361_v24 = vld [vmem:[%s2636_s27 + $0x300] sm:$0xff]  ;;  %v2010_v26 = vcombine.high %v353_v18, %v357_v19  ;;  %v2009_v31 = vcombine.low %v353_v18, %v357_v19  ;;  %v367_v37 = vld [vmem:[%s2636_s27 + $0x330] sm:$0xff]  ;;  %v266_v57 = vld [vmem:[%s2636_s27 + $0x8] sm:$0xff]  ;;  %v1940_v14 = vcombine.high %v282_v10, %v286_v11 }
  0x6c   : > { %1055 = vmatprep.subr.bf16.mxu1 %v1970_v48  ;;  %1141 = vmatprep.subr.bf16.mxu0 %v1974_v60  ;;  %v365_v25 = vld [vmem:[%s2636_s27 + $0x320] sm:$0xff]  ;;  %v371_v45 = vld [vmem:[%s2636_s27 + $0x350] sm:$0xff]  ;;  %v2022_v47 = vcombine.high %v363_v36, %v367_v37  ;;  %v2021_v52 = vcombine.low %v363_v36, %v367_v37  ;;  %v1939_v19 = vcombine.low %v282_v10, %v286_v11  ;;  %v306_v28 = vld [vmem:[%s2636_s27 + $0x148] sm:$0xff] }
  0x6d   : > { %v369_v32 = vld [vmem:[%s2636_s27 + $0x340] sm:$0xff]  ;;  %v2018_v34 = vcombine.high %v361_v24, %v365_v25  ;;  %v2017_v39 = vcombine.low %v361_v24, %v365_v25  ;;  %v375_v46 = vld [vmem:[%s2636_s27 + $0x370] sm:$0xff]  ;;  %v310_v29 = vld [vmem:[%s2636_s27 + $0x168] sm:$0xff] }
  0x6e   : > { %v373_v33 = vld [vmem:[%s2636_s27 + $0x360] sm:$0xff]  ;;  %v379_v53 = vld [vmem:[%s2636_s27 + $0x390] sm:$0xff]  ;;  %v2029_v60 = vcombine.low %v371_v45, %v375_v46  ;;  %v1963_v37 = vcombine.low %v306_v28, %v310_v29  ;;  %v378_v10 = vld [vmem:[%s2636_s27 + $0x388] sm:$0xff] }
  0x6f   : > { %1056 = vmatpush1.bf16.msra.mxu1 %v1969_v55  ;;  %1142 = vmatpush1.bf16.msra.mxu0 %v1973_v1  ;;  %v377_v40 = vld [vmem:[%s2636_s27 + $0x380] sm:$0xff]  ;;  %v2026_v43 = vcombine.high %v369_v32, %v373_v33  ;;  %v2025_v48 = vcombine.low %v369_v32, %v373_v33  ;;  %v383_v54 = vld [vmem:[%s2636_s27 + $0x3b0] sm:$0xff]  ;;  %v2030_v55 = vcombine.high %v371_v45, %v375_v46  ;;  %v274_v1 = vld [vmem:[%s2636_s27 + $0x48] sm:$0xff] }
  0x70   : > { %1057 = vmatprep.subr.bf16.mxu1 %v1978_v56  ;;  %1143 = vmatprep.subr.bf16.mxu0 %v1982_v4  ;;  %v381_v42 = vld [vmem:[%s2636_s27 + $0x3a0] sm:$0xff]  ;;  %v387_v61 = vld [vmem:[%s2636_s27 + $0x3d0] sm:$0xff]  ;;  %v1924_v4 = vcombine.high %v266_v57, %v270_v58  ;;  %v2037_v5 = vcombine.low %v379_v53, %v383_v54  ;;  %v1931_v13 = vcombine.low %v274_v1, %v278_v2  ;;  %v382_v11 = vld [vmem:[%s2636_s27 + $0x3a8] sm:$0xff] }
  0x71   : > { %v385_v49 = vld [vmem:[%s2636_s27 + $0x3c0] sm:$0xff]  ;;  %v2034_v51 = vcombine.high %v377_v40, %v381_v42  ;;  %v2033_v56 = vcombine.low %v377_v40, %v381_v42  ;;  %v391_v62 = vld [vmem:[%s2636_s27 + $0x3f0] sm:$0xff]  ;;  %v1964_v32 = vcombine.high %v306_v28, %v310_v29  ;;  %v322_v40 = vld [vmem:[%s2636_s27 + $0x1c8] sm:$0xff] }
  0x72   : > { %v389_v50 = vld [vmem:[%s2636_s27 + $0x3e0] sm:$0xff]  ;;  %v2046_v6 = vcombine.high %v387_v61, %v391_v62  ;;  %v2208_v18 = vld [vmem:[%s2642_s25 + $0x14] ss:$8 sps:$4 sm:$0xff]   ;;  %v2206_v21 = vld [vmem:[%s2642_s25 + $0x10] ss:$8 sps:$4 sm:$0xff]  }
  0x73   : > { %1058 = vmatpush1.bf16.msra.mxu1 %v1977_v63  ;;  %1144 = vmatpush1.bf16.msra.mxu0 %v1981_v9  ;;  %v2042_v59 = vcombine.high %v385_v49, %v389_v50  ;;  %v2038_v63 = vcombine.high %v379_v53, %v383_v54  ;;  %v2726_v3 = vld [vmem:[%s2934_s0] ss:$8 sps:$4 sm:$0xff]   ;;  %v2045_v9 = vcombine.low %v387_v61, %v391_v62  ;;  %v2211_v24 = vld [vmem:[%s2642_s25 + $0x24] ss:$8 sps:$4 sm:$0xff]   ;;  %v2212_v33 = vld [vmem:[%s2642_s25 + $0x30] ss:$8 sps:$4 sm:$0xff]  }
  0x74   : > { %1059 = vmatprep.subr.bf16.mxu1 %v1986_v0  ;;  %1145 = vmatprep.subr.bf16.mxu0 %v1990_v12  ;;  %v2041_v0 = vcombine.low %v385_v49, %v389_v50  ;;  %v2205_v12 = vld [vmem:[%s2642_s25 + $0x4] ss:$8 sps:$4 sm:$0xff]   ;;  %v2218_v46 = vld [vmem:[%s2642_s25 + $0x50] ss:$8 sps:$4 sm:$0xff]  }
  0x75   : > { %v2217_v36 = vld [vmem:[%s2642_s25 + $0x44] ss:$8 sps:$4 sm:$0xff]  }
  0x76   : > { %v326_v42 = vld [vmem:[%s2636_s27 + $0x1e8] sm:$0xff] }
  0x77   : > { %1060 = vmatpush1.bf16.msra.mxu1 %v1985_v7  ;;  %1146 = vmatpush1.bf16.msra.mxu0 %v1989_v17  ;;  %v1923_v7 = vcombine.low %v266_v57, %v270_v58  ;;  %v294_v17 = vld [vmem:[%s2636_s27 + $0xe8] sm:$0xff]  ;;  %v1980_v45 = vcombine.high %v322_v40, %v326_v42  ;;  %v1979_v50 = vcombine.low %v322_v40, %v326_v42  ;;  %v316_v42 = vld [vmem:[%s2636_s27 + $0x198] sm:$0xff] }
  0x78   : > { %1061 = vmatprep.subr.bf16.mxu1 %v1994_v8  ;;  %1147 = vmatprep.subr.bf16.mxu0 %v1998_v20  ;;  %v1932_v8 = vcombine.high %v274_v1, %v278_v2  ;;  %v2223_v49 = vld [vmem:[%s2642_s25 + $0x64] ss:$8 sps:$4 sm:$0xff]  }
  0x79   : > { %v338_v53 = vld [vmem:[%s2636_s27 + $0x248] sm:$0xff] }
  0x7a   : > { %v342_v54 = vld [vmem:[%s2636_s27 + $0x268] sm:$0xff] }
  0x7b   : > { %1062 = vmatpush1.bf16.msra.mxu1 %v1993_v15  ;;  %1148 = vmatpush1.bf16.msra.mxu0 %v1997_v27  ;;  %v2203_v15 = vld [vmem:[%s2642_s25] ss:$8 sps:$4 sm:$0xff]  }
  0x7c   : > { %1063 = vmatprep.subr.bf16.mxu1 %v2002_v16  ;;  %1149 = vmatprep.subr.bf16.mxu0 %v2006_v30  ;;  %v290_v16 = vld [vmem:[%s2636_s27 + $0xc8] sm:$0xff]  ;;  %v2214_v30 = vld [vmem:[%s2642_s25 + $0x34] ss:$8 sps:$4 sm:$0xff]  }
  0x7d   : > { %v1948_v20 = vcombine.high %v290_v16, %v294_v17  ;;  %v1947_v25 = vcombine.low %v290_v16, %v294_v17  ;;  %v2209_v27 = vld [vmem:[%s2642_s25 + $0x20] ss:$8 sps:$4 sm:$0xff]   ;;  %v2035_v16 = vcombine.low %v378_v10, %v382_v11 }
  0x7e   : > { %v346_v57 = vld [vmem:[%s2636_s27 + $0x288] sm:$0xff] }
  0x7f   : > { %1064 = vmatpush1.bf16.msra.mxu1 %v2001_v23  ;;  %1150 = vmatpush1.bf16.msra.mxu0 %v2005_v35  ;;  %v302_v23 = vld [vmem:[%s2636_s27 + $0x128] sm:$0xff] }
  0x80   : > { %1065 = vmatprep.subr.bf16.mxu1 %v2010_v26  ;;  %1151 = vmatprep.subr.bf16.mxu0 %v2014_v38  ;;  %v1956_v26 = vcombine.high %v298_v22, %v302_v23  ;;  %v318_v35 = vld [vmem:[%s2636_s27 + $0x1a8] sm:$0xff] }
  0x81   : > { %v350_v58 = vld [vmem:[%s2636_s27 + $0x2a8] sm:$0xff] }
  0x82   : > { %v354_v61 = vld [vmem:[%s2636_s27 + $0x2c8] sm:$0xff] }
  0x83   : > { %1066 = vmatpush1.bf16.msra.mxu1 %v2009_v31  ;;  %1152 = vmatpush1.bf16.msra.mxu0 %v2013_v44  ;;  %v1955_v31 = vcombine.low %v298_v22, %v302_v23  ;;  %v358_v62 = vld [vmem:[%s2636_s27 + $0x2e8] sm:$0xff]  ;;  %v276_v22 = vld [vmem:[%s2636_s27 + $0x58] sm:$0xff] }
  0x84   : > { %1067 = vmatprep.subr.bf16.mxu1 %v2018_v34  ;;  %1153 = vmatprep.subr.bf16.mxu0 %v2022_v47  ;;  %v314_v34 = vld [vmem:[%s2636_s27 + $0x188] sm:$0xff]  ;;  %v280_v23 = vld [vmem:[%s2636_s27 + $0x78] sm:$0xff] }
  0x85   : > { %v1972_v38 = vcombine.high %v314_v34, %v318_v35  ;;  %v1971_v44 = vcombine.low %v314_v34, %v318_v35  ;;  %v330_v47 = vld [vmem:[%s2636_s27 + $0x208] sm:$0xff]  ;;  %v1935_v28 = vcombine.low %v276_v22, %v280_v23  ;;  %v300_v34 = vld [vmem:[%s2636_s27 + $0x118] sm:$0xff] }
  0x86   : > { %v362_v1 = vld [vmem:[%s2636_s27 + $0x308] sm:$0xff]  ;;  %v304_v35 = vld [vmem:[%s2636_s27 + $0x138] sm:$0xff] }
  0x87   : > { %1068 = vmatpush1.bf16.msra.mxu1 %v2017_v39  ;;  %1154 = vmatpush1.bf16.msra.mxu0 %v2021_v52  ;;  %v2215_v39 = vld [vmem:[%s2642_s25 + $0x40] ss:$8 sps:$4 sm:$0xff]  }
  0x88   : > { %1069 = vmatprep.subr.bf16.mxu1 %v2026_v43  ;;  %1155 = vmatprep.subr.bf16.mxu0 %v2030_v55  ;;  %v2220_v43 = vld [vmem:[%s2642_s25 + $0x54] ss:$8 sps:$4 sm:$0xff]   ;;  %v2221_v52 = vld [vmem:[%s2642_s25 + $0x60] ss:$8 sps:$4 sm:$0xff]  }
  0x89   : > { %v366_v2 = vld [vmem:[%s2636_s27 + $0x328] sm:$0xff] }
  0x8b   : > { %1070 = vmatpush1.bf16.msra.mxu1 %v2025_v48  ;;  %1156 = vmatpush1.bf16.msra.mxu0 %v2029_v60  ;;  %v334_v48 = vld [vmem:[%s2636_s27 + $0x228] sm:$0xff]  ;;  %v2004_v60 = vcombine.high %v346_v57, %v350_v58 }
  0x8c   : > { %1071 = vmatprep.subr.bf16.mxu1 %v2034_v51  ;;  %1157 = vmatprep.subr.bf16.mxu0 %v2038_v63  ;;  %v1988_v51 = vcombine.high %v330_v47, %v334_v48  ;;  %v1987_v55 = vcombine.low %v330_v47, %v334_v48  ;;  %v2003_v63 = vcombine.low %v346_v57, %v350_v58  ;;  %v2224_v47 = vld [vmem:[%s2642_s25 + $0x70] ss:$8 sps:$4 sm:$0xff]   ;;  %v2232_v57 = vld [vmem:[%s2642_s25 + $0x94] ss:$8 sps:$4 sm:$0xff]  }
  0x8d   : > { %v324_v48 = vld [vmem:[%s2636_s27 + $0x1d8] sm:$0xff] }
  0x8f   : > { %1072 = vmatpush1.bf16.msra.mxu1 %v2033_v56  ;;  %1158 = vmatpush1.bf16.msra.mxu0 %v2037_v5  ;;  %v1996_v56 = vcombine.high %v338_v53, %v342_v54  ;;  %v2020_v5 = vcombine.high %v362_v1, %v366_v2 }
  0x90   : > { %1073 = vmatprep.subr.bf16.mxu1 %v2042_v59  ;;  %1159 = vmatprep.subr.bf16.mxu0 %v2046_v6  ;;  %v1995_v59 = vcombine.low %v338_v53, %v342_v54  ;;  %v370_v6 = vld [vmem:[%s2636_s27 + $0x348] sm:$0xff]  ;;  %v332_v54 = vld [vmem:[%s2636_s27 + $0x218] sm:$0xff] }
  0x91   : > { %v2227_v53 = vld [vmem:[%s2642_s25 + $0x80] ss:$8 sps:$4 sm:$0xff]  }
  0x93   : > { %1074 = vmatpush1.bf16.msra.mxu1 %v2041_v0  ;;  %1160 = vmatpush1.bf16.msra.mxu0 %v2045_v9  ;;  %v2012_v0 = vcombine.high %v354_v61, %v358_v62 }
  0x94   : > { %1086 = vmatprep.subr.bf16.mxu1 %v1924_v4  ;;  %1683 = vmatprep.subr.bf16.mxu0 %v2205_v12  ;;  %v2011_v4 = vcombine.low %v354_v61, %v358_v62  ;;  %v344_v61 = vld [vmem:[%s2636_s27 + $0x278] sm:$0xff] }
  0x96   : > { %1076 = vmatmul.mubr.bf16.vlgmr.msra.gmra.mrb[0].mxu1 %v2726_v3  ;;  %1162 = vmatmul.mubr.bf16.vlgmr.msra.gmra.mrb[0].mxu0 %v2726_v3 }
  0x97   : > { %1087 = vmatpush1.bf16.msra.mxu1 %v1923_v7  ;;  %1118 = vmatprep.mubr.bf16.mxu1 %v2673_v41  ;;  %v374_v7 = vld [vmem:[%s2636_s27 + $0x368] sm:$0xff] }
  0x98   : > { %1088 = vmatprep.subr.bf16.mxu1 %v1932_v8  ;;  %1684 = vmatpush1.bf16.msra.mxu0 %v2203_v15  ;;  %v2019_v8 = vcombine.low %v362_v1, %v366_v2  ;;  %v2028_v9 = vcombine.high %v370_v6, %v374_v7  ;;  %v2027_v12 = vcombine.low %v370_v6, %v374_v7  ;;  %v390_v15 = vld [vmem:[%s2636_s27 + $0x3e8] sm:$0xff]  ;;  %v348_v2 = vld [vmem:[%s2636_s27 + $0x298] sm:$0xff] }
  0x99   : > { %1685 = vmatprep.subr.bf16.mxu0 %v2208_v18  ;;  %v268_v18 = vld [vmem:[%s2636_s27 + $0x18] sm:$0xff]  ;;  %v2233_v1 = vld [vmem:[%s2642_s25 + $0xa0] ss:$8 sps:$4 sm:$0xff]  }
  0x9a   : > { %v2236_v6 = vld [vmem:[%s2642_s25 + $0xb0] ss:$8 sps:$4 sm:$0xff]   ;;  %v2238_v7 = vld [vmem:[%s2642_s25 + $0xb4] ss:$8 sps:$4 sm:$0xff]  }
  0x9b   : > { %1089 = vmatpush1.bf16.msra.mxu1 %v1931_v13  ;;  %v2036_v13 = vcombine.high %v378_v10, %v382_v11  ;;  %v356_v10 = vld [vmem:[%s2636_s27 + $0x2d8] sm:$0xff] }
  0x9c   : > { %1090 = vmatprep.subr.bf16.mxu1 %v1940_v14  ;;  %1686 = vmatpush1.bf16.msra.mxu0 %v2206_v21  ;;  %v386_v14 = vld [vmem:[%s2636_s27 + $0x3c8] sm:$0xff]  ;;  %v360_v11 = vld [vmem:[%s2636_s27 + $0x2f8] sm:$0xff] }
  0x9d   : > { %1687 = vmatprep.subr.bf16.mxu0 %v2211_v24  ;;  %v2044_v17 = vcombine.high %v386_v14, %v390_v15 }
  0x9f   : > { %1091 = vmatpush1.bf16.msra.mxu1 %v1939_v19  ;;  %v272_v19 = vld [vmem:[%s2636_s27 + $0x38] sm:$0xff] }
  0xa0   : > { %1092 = vmatprep.subr.bf16.mxu1 %v1948_v20  ;;  %1688 = vmatpush1.bf16.msra.mxu0 %v2209_v27  ;;  %v2043_v20 = vcombine.low %v386_v14, %v390_v15  ;;  %v1928_v21 = vcombine.high %v268_v18, %v272_v19  ;;  %v1927_v24 = vcombine.low %v268_v18, %v272_v19  ;;  %v288_v27 = vld [vmem:[%s2636_s27 + $0xb8] sm:$0xff] }
  0xa1   : > { %1689 = vmatprep.subr.bf16.mxu0 %v2214_v30  ;;  %v292_v30 = vld [vmem:[%s2636_s27 + $0xd8] sm:$0xff]  ;;  %v2016_v15 = vcombine.high %v356_v10, %v360_v11  ;;  %v2015_v19 = vcombine.low %v356_v10, %v360_v11 }
  0xa2   : > { %v2244_v14 = vld [vmem:[%s2642_s25 + $0xd4] ss:$8 sps:$4 sm:$0xff]   ;;  %v2242_v18 = vld [vmem:[%s2642_s25 + $0xd0] ss:$8 sps:$4 sm:$0xff]  }
  0xa3   : > { %1093 = vmatpush1.bf16.msra.mxu1 %v1947_v25  ;;  %v1936_v25 = vcombine.high %v276_v22, %v280_v23  ;;  %v376_v22 = vld [vmem:[%s2636_s27 + $0x378] sm:$0xff] }
  0xa4   : > { %1094 = vmatprep.subr.bf16.mxu1 %v1956_v26  ;;  %1690 = vmatpush1.bf16.msra.mxu0 %v2212_v33  ;;  %v284_v26 = vld [vmem:[%s2636_s27 + $0x98] sm:$0xff] }
  0xa5   : > { %1691 = vmatprep.subr.bf16.mxu0 %v2217_v36  ;;  %v1944_v29 = vcombine.high %v284_v26, %v288_v27 }
  0xa7   : > { %1095 = vmatpush1.bf16.msra.mxu1 %v1955_v31  ;;  %v296_v31 = vld [vmem:[%s2636_s27 + $0xf8] sm:$0xff] }
  0xa8   : > { %1096 = vmatprep.subr.bf16.mxu1 %v1964_v32  ;;  %1692 = vmatpush1.bf16.msra.mxu0 %v2215_v39  ;;  %v1943_v32 = vcombine.low %v284_v26, %v288_v27  ;;  %v1952_v33 = vcombine.high %v292_v30, %v296_v31  ;;  %v1951_v36 = vcombine.low %v292_v30, %v296_v31  ;;  %v2245_v26 = vld [vmem:[%s2642_s25 + $0xe0] ss:$8 sps:$4 sm:$0xff]   ;;  %v380_v27 = vld [vmem:[%s2636_s27 + $0x398] sm:$0xff] }
  0xa9   : > { %1693 = vmatprep.subr.bf16.mxu0 %v2220_v43  ;;  %v1959_v39 = vcombine.low %v300_v34, %v304_v35  ;;  %v320_v43 = vld [vmem:[%s2636_s27 + $0x1b8] sm:$0xff] }
  0xaa   : > { %v2250_v30 = vld [vmem:[%s2642_s25 + $0xf4] ss:$8 sps:$4 sm:$0xff]  }
  0xab   : > { %1097 = vmatpush1.bf16.msra.mxu1 %v1963_v37  ;;  %v308_v37 = vld [vmem:[%s2636_s27 + $0x158] sm:$0xff] }
  0xac   : > { %1098 = vmatprep.subr.bf16.mxu1 %v1972_v38  ;;  %1694 = vmatpush1.bf16.msra.mxu0 %v2218_v46  ;;  %v312_v38 = vld [vmem:[%s2636_s27 + $0x178] sm:$0xff]  ;;  %v1976_v46 = vcombine.high %v316_v42, %v320_v43 }
  0xad   : > { %1695 = vmatprep.subr.bf16.mxu0 %v2223_v49  ;;  %v1968_v40 = vcombine.high %v308_v37, %v312_v38  ;;  %v328_v49 = vld [vmem:[%s2636_s27 + $0x1f8] sm:$0xff] }
  0xaf   : > { %1099 = vmatpush1.bf16.msra.mxu1 %v1971_v44  ;;  %v1967_v44 = vcombine.low %v308_v37, %v312_v38  ;;  %v2253_v37 = vld [vmem:[%s2642_s25 + $0x104] ss:$8 sps:$4 sm:$0xff]  }
  0xb0   : > { %1100 = vmatprep.subr.bf16.mxu1 %v1980_v45  ;;  %1696 = vmatpush1.bf16.msra.mxu0 %v2221_v52  ;;  %v2226_v45 = vld [vmem:[%s2642_s25 + $0x74] ss:$8 sps:$4 sm:$0xff]   ;;  %v1984_v52 = vcombine.high %v324_v48, %v328_v49 }
  0xb1   : > { %1697 = vmatprep.subr.bf16.mxu0 %v2226_v45 }
  0xb3   : > { %1101 = vmatpush1.bf16.msra.mxu1 %v1979_v50  ;;  %v1975_v50 = vcombine.low %v316_v42, %v320_v43 }
  0xb4   : > { %1102 = vmatprep.subr.bf16.mxu1 %v1988_v51  ;;  %1698 = vmatpush1.bf16.msra.mxu0 %v2224_v47  ;;  %v2229_v51 = vld [vmem:[%s2642_s25 + $0x84] ss:$8 sps:$4 sm:$0xff]  }
  0xb5   : > { %1699 = vmatprep.subr.bf16.mxu0 %v2229_v51 }
  0xb7   : > { %1103 = vmatpush1.bf16.msra.mxu1 %v1987_v55  ;;  %v336_v55 = vld [vmem:[%s2636_s27 + $0x238] sm:$0xff] }
  0xb8   : > { %1104 = vmatprep.subr.bf16.mxu1 %v1996_v56  ;;  %1700 = vmatpush1.bf16.msra.mxu0 %v2227_v53  ;;  %v1983_v56 = vcombine.low %v324_v48, %v328_v49  ;;  %v1992_v58 = vcombine.high %v332_v54, %v336_v55  ;;  %v1991_v62 = vcombine.low %v332_v54, %v336_v55 }
  0xb9   : > { %1701 = vmatprep.subr.bf16.mxu0 %v2232_v57 }
  0xbb   : > { %1105 = vmatpush1.bf16.msra.mxu1 %v1995_v59  ;;  %v2230_v59 = vld [vmem:[%s2642_s25 + $0x90] ss:$8 sps:$4 sm:$0xff]  }
  0xbc   : > { %1106 = vmatprep.subr.bf16.mxu1 %v2004_v60  ;;  %v340_v60 = vld [vmem:[%s2636_s27 + $0x258] sm:$0xff]  ;;  %1702 = vmatpush1.bf16.msra.mxu0 %v2230_v59 }
  0xbf   : > { %1107 = vmatpush1.bf16.msra.mxu1 %v2003_v63  ;;  %v2235_v63 = vld [vmem:[%s2642_s25 + $0xa4] ss:$8 sps:$4 sm:$0xff]  }
  0xc0   : > { %1108 = vmatprep.subr.bf16.mxu1 %v2012_v0  ;;  %v2000_v0 = vcombine.high %v340_v60, %v344_v61  ;;  %1703 = vmatprep.subr.bf16.mxu0 %v2235_v63 }
  0xc1   : > { %1704 = vmatpush1.bf16.msra.mxu0 %v2233_v1 }
  0xc2   : > { %1705 = vmatprep.subr.bf16.mxu0 %v2238_v7 }
  0xc3   : > { %1109 = vmatpush1.bf16.msra.mxu1 %v2011_v4  ;;  %v352_v4 = vld [vmem:[%s2636_s27 + $0x2b8] sm:$0xff] }
  0xc4   : > { %1110 = vmatprep.subr.bf16.mxu1 %v2020_v5  ;;  %v1999_v5 = vcombine.low %v340_v60, %v344_v61 }
  0xc5   : > { %1706 = vmatpush1.bf16.msra.mxu0 %v2236_v6 }
  0xc7   : > { %1111 = vmatpush1.bf16.msra.mxu1 %v2019_v8  ;;  %v2008_v8 = vcombine.high %v348_v2, %v352_v4 }
  0xc8   : > { %1112 = vmatprep.subr.bf16.mxu1 %v2028_v9  ;;  %v2241_v9 = vld [vmem:[%s2642_s25 + $0xc4] ss:$8 sps:$4 sm:$0xff]  }
  0xc9   : > { %1707 = vmatprep.subr.bf16.mxu0 %v2241_v9 }
  0xcb   : > { %1113 = vmatpush1.bf16.msra.mxu1 %v2027_v12  ;;  %v2239_v12 = vld [vmem:[%s2642_s25 + $0xc0] ss:$8 sps:$4 sm:$0xff]  }
  0xcc   : > { %1114 = vmatprep.subr.bf16.mxu1 %v2036_v13  ;;  %v2007_v13 = vcombine.low %v348_v2, %v352_v4  ;;  %1708 = vmatpush1.bf16.msra.mxu0 %v2239_v12 }
  0xcd   : > { %1709 = vmatprep.subr.bf16.mxu0 %v2244_v14 }
  0xcf   : > { %1115 = vmatpush1.bf16.msra.mxu1 %v2035_v16  ;;  %v364_v16 = vld [vmem:[%s2636_s27 + $0x318] sm:$0xff] }
  0xd0   : > { %1116 = vmatprep.subr.bf16.mxu1 %v2044_v17  ;;  %v368_v17 = vld [vmem:[%s2636_s27 + $0x338] sm:$0xff]  ;;  %1710 = vmatpush1.bf16.msra.mxu0 %v2242_v18 }
  0xd1   : > { %v2023_v23 = vcombine.low %v364_v16, %v368_v17 }
  0xd3   : > { %1117 = vmatpush1.bf16.msra.mxu1 %v2043_v20  ;;  %v2024_v20 = vcombine.high %v364_v16, %v368_v17 }
  0xd4   : > { %1172 = vmatprep.subr.bf16.mxu1 %v1928_v21  ;;  %v372_v21 = vld [vmem:[%s2636_s27 + $0x358] sm:$0xff] }
  0xd6   : > { %1119 = vmatmul.mubr.bf16.vlgmr.msra.gmra.mrb[4].mxu1 %v2726_v3 }
  0xd7   : > { %1173 = vmatpush1.bf16.msra.mxu1 %v1927_v24  ;;  %1204 = vmatprep.mubr.bf16.mxu1 %v2673_v41  ;;  %v1960_v41 = vcombine.high %v300_v34, %v304_v35  ;;  %v2247_v24 = vld [vmem:[%s2642_s25 + $0xe4] ss:$8 sps:$4 sm:$0xff]   ;;  %v392_v34 = vld [vmem:[%s2636_s27 + $0x3f8] sm:$0xff] }
  0xd8   : > { %1174 = vmatprep.subr.bf16.mxu1 %v1936_v25  ;;  %v2032_v25 = vcombine.high %v372_v21, %v376_v22  ;;  %1711 = vmatprep.subr.bf16.mxu0 %v2247_v24 }
  0xd9   : > { %1712 = vmatpush1.bf16.msra.mxu0 %v2245_v26  ;;  %v2256_v26 = vld [vmem:[%s2642_s25 + $0x114] ss:$8 sps:$4 sm:$0xff]  }
  0xda   : > { %1713 = vmatprep.subr.bf16.mxu0 %v2250_v30  ;;  %v2262_v30 = vld [vmem:[%s2642_s25 + $0x134] ss:$8 sps:$4 sm:$0xff]  }
  0xdb   : > { %1175 = vmatpush1.bf16.msra.mxu1 %v1935_v28  ;;  %v384_v28 = vld [vmem:[%s2636_s27 + $0x3b8] sm:$0xff] }
  0xdc   : > { %1176 = vmatprep.subr.bf16.mxu1 %v1944_v29  ;;  %v2031_v29 = vcombine.low %v372_v21, %v376_v22  ;;  %v2040_v31 = vcombine.high %v380_v27, %v384_v28  ;;  %v2039_v35 = vcombine.low %v380_v27, %v384_v28  ;;  %v2254_v27 = vld [vmem:[%s2642_s25 + $0x110] ss:$8 sps:$4 sm:$0xff]   ;;  %v2259_v28 = vld [vmem:[%s2642_s25 + $0x124] ss:$8 sps:$4 sm:$0xff]  }
  0xdf   : > { %1177 = vmatpush1.bf16.msra.mxu1 %v1943_v32  ;;  %v2248_v32 = vld [vmem:[%s2642_s25 + $0xf0] ss:$8 sps:$4 sm:$0xff]  }
  0xe0   : > { %1178 = vmatprep.subr.bf16.mxu1 %v1952_v33  ;;  %v388_v33 = vld [vmem:[%s2636_s27 + $0x3d8] sm:$0xff]  ;;  %1714 = vmatpush1.bf16.msra.mxu0 %v2248_v32  ;;  %v2265_v32 = vld [vmem:[%s2642_s25 + $0x144] ss:$8 sps:$4 sm:$0xff]  }
  0xe1   : > { %1726 = vmatprep.subr.bf16.mxu0 %v2253_v37  ;;  %v2274_v37 = vld [vmem:[%s2642_s25 + $0x174] ss:$8 sps:$4 sm:$0xff]  }
  0xe3   : > { %1179 = vmatpush1.bf16.msra.mxu1 %v1951_v36  ;;  %v2048_v36 = vcombine.high %v388_v33, %v392_v34 }
  0xe4   : > { %1180 = vmatprep.subr.bf16.mxu1 %v1960_v41  ;;  %v2047_v41 = vcombine.low %v388_v33, %v392_v34  ;;  %v2263_v33 = vld [vmem:[%s2642_s25 + $0x140] ss:$8 sps:$4 sm:$0xff]   ;;  %v2268_v34 = vld [vmem:[%s2642_s25 + $0x154] ss:$8 sps:$4 sm:$0xff]  }
  0xe7   : > { %1181 = vmatpush1.bf16.msra.mxu1 %v1959_v39 }
  0xe8   : > { %1182 = vmatprep.subr.bf16.mxu1 %v1968_v40 }
  0xeb   : > { %1183 = vmatpush1.bf16.msra.mxu1 %v1967_v44 }
  0xec   : > { %1184 = vmatprep.subr.bf16.mxu1 %v1976_v46 }
  0xef   : > { %1185 = vmatpush1.bf16.msra.mxu1 %v1975_v50 }
  0xf0   : > { %1186 = vmatprep.subr.bf16.mxu1 %v1984_v52 }
  0xf3   : > { %1187 = vmatpush1.bf16.msra.mxu1 %v1983_v56 }
  0xf4   : > { %1188 = vmatprep.subr.bf16.mxu1 %v1992_v58 }
  0xf7   : > { %1189 = vmatpush1.bf16.msra.mxu1 %v1991_v62 }
  0xf8   : > { %1190 = vmatprep.subr.bf16.mxu1 %v2000_v0 }
  0xfb   : > { %1191 = vmatpush1.bf16.msra.mxu1 %v1999_v5 }
  0xfc   : > { %1192 = vmatprep.subr.bf16.mxu1 %v2008_v8 }
  0xff   : > { %1193 = vmatpush1.bf16.msra.mxu1 %v2007_v13 }
 0x100   : > { %1194 = vmatprep.subr.bf16.mxu1 %v2016_v15 }
 0x103   : > { %1195 = vmatpush1.bf16.msra.mxu1 %v2015_v19 }
 0x104   : > { %1196 = vmatprep.subr.bf16.mxu1 %v2024_v20 }
 0x107   : > { %1197 = vmatpush1.bf16.msra.mxu1 %v2023_v23 }
 0x108   : > { %1198 = vmatprep.subr.bf16.mxu1 %v2032_v25  ;;  %v2251_v25 = vld [vmem:[%s2642_s25 + $0x100] ss:$8 sps:$4 sm:$0xff]  }
 0x10b   : > { %1199 = vmatpush1.bf16.msra.mxu1 %v2031_v29  ;;  %v2257_v29 = vld [vmem:[%s2642_s25 + $0x120] ss:$8 sps:$4 sm:$0xff]  }
 0x10c   : > { %1200 = vmatprep.subr.bf16.mxu1 %v2040_v31  ;;  %v2260_v31 = vld [vmem:[%s2642_s25 + $0x130] ss:$8 sps:$4 sm:$0xff]  }
 0x10f   : > { %1201 = vmatpush1.bf16.msra.mxu1 %v2039_v35  ;;  %v2266_v35 = vld [vmem:[%s2642_s25 + $0x150] ss:$8 sps:$4 sm:$0xff]  }
 0x110   : > { %1202 = vmatprep.subr.bf16.mxu1 %v2048_v36  ;;  %v2271_v36 = vld [vmem:[%s2642_s25 + $0x164] ss:$8 sps:$4 sm:$0xff]  }
 0x113   : > { %1203 = vmatpush1.bf16.msra.mxu1 %v2047_v41  ;;  %v2269_v41 = vld [vmem:[%s2642_s25 + $0x160] ss:$8 sps:$4 sm:$0xff]  }
 0x116   : > { %1205 = vmatmul.mubr.bf16.vlgmr.msra.gmra.mrb[8].mxu1 %v2726_v3 }
 0x169   : > { %v1077_v38 = vpop.f32.mrb[0].mxu1  ;;  %v1163_v51 = vpop.f32.mrb[0].mxu0 }
 0x16a   : > { %v1215_v39 = vmul.f32 %v1077_v38, %v1077_v38  ;;  %v1079_v40 = vpop.f32.mrb[1].mxu1  ;;  %v1165_v54 = vpop.f32.mrb[1].mxu0 }
 0x16b   : > { %v1216_v42 = vmul.f32 %v1079_v40, %v1079_v40  ;;  %v1081_v43 = vpop.f32.mrb[2].mxu1  ;;  %v1167_v56 = vpop.f32.mrb[2].mxu0 }
 0x16c   : > { %v1223_v44 = vmul.f32 %v1215_v39, %v1077_v38  ;;  %v1219_v45 = vmul.f32 %v1081_v43, %v1081_v43  ;;  %v1083_v46 = vpop.f32.mrb[3].mxu1  ;;  %v1169_v59 = vpop.f32.mrb[3].mxu0  ;;  %v2277_v39 = vld [vmem:[%s2642_s25 + $0x184] ss:$8 sps:$4 sm:$0xff]  }
 0x16d   : > { %v1224_v47 = vmul.f32 %v1216_v42, %v1079_v40  ;;  %v1220_v48 = vmul.f32 %v1083_v46, %v1083_v46 }
 0x16e   : > { %v1231_v49 = vmul.f32 0.044715, %v1223_v44  ;;  %v1227_v50 = vmul.f32 %v1219_v45, %v1081_v43  ;;  %v2280_v45 = vld [vmem:[%s2642_s25 + $0x194] ss:$8 sps:$4 sm:$0xff]  }
 0x16f   : > { %v1232_v52 = vmul.f32 0.044715, %v1224_v47  ;;  %v1228_v53 = vmul.f32 %v1220_v48, %v1083_v46  ;;  %v2278_v47 = vld [vmem:[%s2642_s25 + $0x190] ss:$8 sps:$4 sm:$0xff]   ;;  %v2283_v48 = vld [vmem:[%s2642_s25 + $0x1a4] ss:$8 sps:$4 sm:$0xff]  }
 0x170   : > { %v1239_v55 = vadd.f32 %v1231_v49, %v1077_v38  ;;  %v1235_v3 = vmul.f32 0.044715, %v1227_v50  ;;  %v2281_v49 = vld [vmem:[%s2642_s25 + $0x1a0] ss:$8 sps:$4 sm:$0xff]   ;;  %v2286_v50 = vld [vmem:[%s2642_s25 + $0x1b4] ss:$8 sps:$4 sm:$0xff]  }
 0x171   : > { %v1240_v57 = vadd.f32 %v1232_v52, %v1079_v40  ;;  %v1236_v58 = vmul.f32 0.044715, %v1228_v53  ;;  %v2289_v52 = vld [vmem:[%s2642_s25 + $0x1c4] ss:$8 sps:$4 sm:$0xff]   ;;  %v2287_v53 = vld [vmem:[%s2642_s25 + $0x1c0] ss:$8 sps:$4 sm:$0xff]  }
 0x172   : > { %v1247_v60 = vmul.f32 0.7978846, %v1239_v55  ;;  %v1243_v61 = vadd.f32 %v1235_v3, %v1081_v43  ;;  %v2290_v55 = vld [vmem:[%s2642_s25 + $0x1d0] ss:$8 sps:$4 sm:$0xff]  }
 0x173   : > { %v1248_v62 = vmul.f32 0.7978846, %v1240_v57  ;;  %v1244_v63 = vadd.f32 %v1236_v58, %v1083_v46 }
 0x174   : > { %2299 = vtanh.f32 %v1247_v60  ;;  %v1251_v0 = vmul.f32 0.7978846, %v1243_v61  ;;  %v2293_v60 = vld [vmem:[%s2642_s25 + $0x1e0] ss:$8 sps:$4 sm:$0xff]  }
 0x175   : > { %2301 = vtanh.f32 %v1248_v62  ;;  %v1252_v1 = vmul.f32 0.7978846, %v1244_v63  ;;  %v2298_v62 = vld [vmem:[%s2642_s25 + $0x1f4] ss:$8 sps:$4 sm:$0xff]  }
 0x176   : > { %2303 = vtanh.f32 %v1251_v0 }
 0x177   : > { %2305 = vtanh.f32 %v1252_v1 }
 0x17e   : > { %v2300_v2 = vpop.eup %2299 }
 0x17f   : > { %v2302_v4 = vpop.eup %2301  ;;  %v1263_v5 = vadd.f32 1.0, %v2300_v2  ;;  %v2296_v2 = vld [vmem:[%s2642_s25 + $0x1f0] ss:$8 sps:$4 sm:$0xff]  }
 0x180   : > { %v2304_v6 = vpop.eup %2303  ;;  %v1264_v7 = vadd.f32 1.0, %v2302_v4 }
 0x181   : > { %v2306_v8 = vpop.eup %2305  ;;  %v1271_v9 = vmul.f32 0.5, %v1263_v5  ;;  %v1267_v10 = vadd.f32 1.0, %v2304_v6 }
 0x182   : > { %v1272_v11 = vmul.f32 0.5, %v1264_v7  ;;  %v1268_v12 = vadd.f32 1.0, %v2306_v8 }
 0x183   : > { %v1279_v13 = vmul.f32 %v1271_v9, %v1077_v38  ;;  %v1275_v14 = vmul.f32 0.5, %v1267_v10  ;;  %v2272_v38 = vld [vmem:[%s2642_s25 + $0x170] ss:$8 sps:$4 sm:$0xff]  }
 0x184   : > { %v1280_v15 = vmul.f32 %v1272_v11, %v1079_v40  ;;  %v1276_v16 = vmul.f32 0.5, %v1268_v12 }
 0x185   : > { %v1287_v17 = vmul.f32 %v1279_v13, %v1163_v51  ;;  %v1283_v18 = vmul.f32 %v1275_v14, %v1081_v43  ;;  %v2275_v43 = vld [vmem:[%s2642_s25 + $0x180] ss:$8 sps:$4 sm:$0xff]   ;;  %v2284_v51 = vld [vmem:[%s2642_s25 + $0x1b0] ss:$8 sps:$4 sm:$0xff]  }
 0x186   : > { %v1288_v19 = vmul.f32 %v1280_v15, %v1165_v54  ;;  %v1284_v20 = vmul.f32 %v1276_v16, %v1083_v46  ;;  %v2292_v54 = vld [vmem:[%s2642_s25 + $0x1d4] ss:$8 sps:$4 sm:$0xff]  }
 0x187   : > { %v1291_v21 = vmul.f32 %v1283_v18, %v1167_v56  ;;  %v2295_v56 = vld [vmem:[%s2642_s25 + $0x1e4] ss:$8 sps:$4 sm:$0xff]  }
 0x188   : > { %v1292_v22 = vmul.f32 %v1284_v20, %v1169_v59 }
 0x189   : > { %v1295_v23 = vpack.c.bf16 %v1291_v21, %v1287_v17 }
 0x18a   : > { %v1296_v24 = vpack.c.bf16 %v1292_v22, %v1288_v19 }
 0x18c   : > { %1715 = vmatprep.mubr.bf16.mxu0 %v1296_v24 }
 0x18d   : > { %1716 = vmatmul.mubr.bf16.vlgmr.msra.gmra.mrb[4].mxu0 %v1295_v23 }
 0x18e   : > { %1727 = vmatpush1.bf16.msra.mxu0 %v2251_v25 }
 0x18f   : > { %1728 = vmatprep.subr.bf16.mxu0 %v2256_v26 }
 0x192   : > { %1729 = vmatpush1.bf16.msra.mxu0 %v2254_v27 }
 0x193   : > { %1730 = vmatprep.subr.bf16.mxu0 %v2259_v28 }
 0x196   : > { %1731 = vmatpush1.bf16.msra.mxu0 %v2257_v29 }
 0x197   : > { %1732 = vmatprep.subr.bf16.mxu0 %v2262_v30 }
 0x19a   : > { %1733 = vmatpush1.bf16.msra.mxu0 %v2260_v31 }
 0x19b   : > { %1734 = vmatprep.subr.bf16.mxu0 %v2265_v32 }
 0x19e   : > { %1735 = vmatpush1.bf16.msra.mxu0 %v2263_v33 }
 0x19f   : > { %1736 = vmatprep.subr.bf16.mxu0 %v2268_v34 }
 0x1a2   : > { %1737 = vmatpush1.bf16.msra.mxu0 %v2266_v35 }
 0x1a3   : > { %1738 = vmatprep.subr.bf16.mxu0 %v2271_v36 }
 0x1a6   : > { %1739 = vmatpush1.bf16.msra.mxu0 %v2269_v41 }
 0x1a7   : > { %1740 = vmatprep.subr.bf16.mxu0 %v2274_v37 }
 0x1a9   : > { %v2843_v40 = vpop.f32.mrb[4].mxu1 }
 0x1aa   : > { %v2845_v42 = vpop.f32.mrb[5].mxu1  ;;  %1741 = vmatpush1.bf16.msra.mxu0 %v2272_v38  ;;  %v1217_v3 = vmul.f32 %v2843_v40, %v2843_v40 }
 0x1ab   : > { %v2848_v44 = vpop.f32.mrb[6].mxu1  ;;  %1742 = vmatprep.subr.bf16.mxu0 %v2277_v39  ;;  %v1218_v57 = vmul.f32 %v2845_v42, %v2845_v42 }
 0x1ac   : > { %v2851_v46 = vpop.f32.mrb[7].mxu1  ;;  %v1221_v58 = vmul.f32 %v2848_v44, %v2848_v44  ;;  %v1225_v61 = vmul.f32 %v1217_v3, %v2843_v40 }
 0x1ad   : > { %v1222_v59 = vmul.f32 %v2851_v46, %v2851_v46  ;;  %v1226_v63 = vmul.f32 %v1218_v57, %v2845_v42 }
 0x1ae   : > { %1743 = vmatpush1.bf16.msra.mxu0 %v2275_v43  ;;  %v1229_v0 = vmul.f32 %v1221_v58, %v2848_v44  ;;  %v1233_v4 = vmul.f32 0.044715, %v1225_v61 }
 0x1af   : > { %1744 = vmatprep.subr.bf16.mxu0 %v2280_v45  ;;  %v1230_v1 = vmul.f32 %v1222_v59, %v2851_v46  ;;  %v1234_v5 = vmul.f32 0.044715, %v1226_v63 }
 0x1b0   : > { %v1237_v6 = vmul.f32 0.044715, %v1229_v0  ;;  %v1241_v8 = vadd.f32 %v1233_v4, %v2843_v40 }
 0x1b1   : > { %v1238_v7 = vmul.f32 0.044715, %v1230_v1  ;;  %v1242_v9 = vadd.f32 %v1234_v5, %v2845_v42 }
 0x1b2   : > { %1745 = vmatpush1.bf16.msra.mxu0 %v2278_v47  ;;  %v1245_v10 = vadd.f32 %v1237_v6, %v2848_v44  ;;  %v1249_v12 = vmul.f32 0.7978846, %v1241_v8 }
 0x1b3   : > { %1746 = vmatprep.subr.bf16.mxu0 %v2283_v48  ;;  %v1246_v11 = vadd.f32 %v1238_v7, %v2851_v46  ;;  %v1250_v13 = vmul.f32 0.7978846, %v1242_v9 }
 0x1b4   : > { %v1253_v14 = vmul.f32 0.7978846, %v1245_v10  ;;  %2307 = vtanh.f32 %v1249_v12 }
 0x1b5   : > { %v1254_v15 = vmul.f32 0.7978846, %v1246_v11  ;;  %2309 = vtanh.f32 %v1250_v13 }
 0x1b6   : > { %1747 = vmatpush1.bf16.msra.mxu0 %v2281_v49  ;;  %2311 = vtanh.f32 %v1253_v14 }
 0x1b7   : > { %1748 = vmatprep.subr.bf16.mxu0 %v2286_v50  ;;  %2313 = vtanh.f32 %v1254_v15 }
 0x1ba   : > { %1749 = vmatpush1.bf16.msra.mxu0 %v2284_v51 }
 0x1bb   : > { %1750 = vmatprep.subr.bf16.mxu0 %v2289_v52 }
 0x1be   : > { %1751 = vmatpush1.bf16.msra.mxu0 %v2287_v53  ;;  %v2308_v16 = vpop.eup %2307 }
 0x1bf   : > { %1752 = vmatprep.subr.bf16.mxu0 %v2292_v54  ;;  %v2310_v17 = vpop.eup %2309  ;;  %v1265_v20 = vadd.f32 1.0, %v2308_v16 }
 0x1c0   : > { %v2312_v18 = vpop.eup %2311  ;;  %v1266_v21 = vadd.f32 1.0, %v2310_v17 }
 0x1c1   : > { %v2314_v19 = vpop.eup %2313  ;;  %v1269_v22 = vadd.f32 1.0, %v2312_v18  ;;  %v1273_v24 = vmul.f32 0.5, %v1265_v20 }
 0x1c2   : > { %1753 = vmatpush1.bf16.msra.mxu0 %v2290_v55  ;;  %v1270_v23 = vadd.f32 1.0, %v2314_v19  ;;  %v1274_v25 = vmul.f32 0.5, %v1266_v21 }
 0x1c3   : > { %1754 = vmatprep.subr.bf16.mxu0 %v2295_v56  ;;  %v1277_v26 = vmul.f32 0.5, %v1269_v22  ;;  %v1281_v28 = vmul.f32 %v1273_v24, %v2843_v40 }
 0x1c4   : > { %v1278_v27 = vmul.f32 0.5, %v1270_v23  ;;  %v1282_v30 = vmul.f32 %v1274_v25, %v2845_v42 }
 0x1c5   : > { %v1285_v33 = vmul.f32 %v1277_v26, %v2848_v44 }
 0x1c6   : > { %1755 = vmatpush1.bf16.msra.mxu0 %v2293_v60  ;;  %v1286_v36 = vmul.f32 %v1278_v27, %v2851_v46 }
 0x1c7   : > { %1756 = vmatprep.subr.bf16.mxu0 %v2298_v62 }
 0x1ca   : > { %1757 = vmatpush1.bf16.msra.mxu0 %v2296_v2 }
 0x1e9   : > { %v1206_v29 = vpop.f32.mrb[8].mxu1 }
 0x1ea   : > { %v1289_v31 = vmul.f32 %v1281_v28, %v1206_v29  ;;  %v1208_v32 = vpop.f32.mrb[9].mxu1 }
 0x1eb   : > { %v1290_v34 = vmul.f32 %v1282_v30, %v1208_v32  ;;  %v1210_v35 = vpop.f32.mrb[10].mxu1 }
 0x1ec   : > { %v1293_v41 = vmul.f32 %v1285_v33, %v1210_v35  ;;  %v1212_v37 = vpop.f32.mrb[11].mxu1 }
 0x1ed   : > { %v1294_v38 = vmul.f32 %v1286_v36, %v1212_v37 }
 0x1ee   : > { %v1297_v39 = vpack.c.bf16 %v1293_v41, %v1289_v31 }
 0x1ef   : > { %v1298_v43 = vpack.c.bf16 %v1294_v38, %v1290_v34 }
 0x1f1   : > { %1758 = vmatprep.mubr.bf16.mxu0 %v1298_v43 }
 0x1f2   : > { %1759 = vmatmul.mubr.bf16.vlgmr.msra.gmra.mrb[4].mxu0 %v1297_v39 }
 0x2c2   : > { %1772 = sbr.rel (%p2113_p9) target bundleno = 714 (0x2ca), region = 44 }
 0x2c5   : > { %v1760_v45 = vpop.f32.mrb[4].mxu0 }
 0x2c6   : > { %v1762_v40 = vpop.f32.mrb[5].mxu0  ;;  %1773 = vst [vmem:[#allocation7] sm:$0xff] (!%p2113_p9), %v1760_v45 }
 0x2c7   : > { %v1764_v47 = vpop.f32.mrb[6].mxu0  ;;  %1774 = vst [vmem:[#allocation7 + $0x8] sm:$0xff] (!%p2113_p9), %v1762_v40 }
 0x2c8   : > { %v1766_v48 = vpop.f32.mrb[7].mxu0  ;;  %1775 = vst [vmem:[#allocation7 + $0x10] sm:$0xff] (!%p2113_p9), %v1764_v47 }
 0x2c9   : > { %1776 = vst [vmem:[#allocation7 + $0x18] sm:$0xff] %v1766_v48 }
 0x2ca PF: > { %p2114_p12 = scmp.le.s32.totalorder %s2451_s15, 0 }
 0x2cc   : > { %1780 = sbr.rel (%p2114_p12) target bundleno = 724 (0x2d4), region = 48 }
 0x2ce   : > { %v1781_v42 = vld [vmem:[#allocation7] sm:$0xff] (!%p2114_p12) }
 0x2cf   : > { %v1782_v44 = vld [vmem:[#allocation7 + $0x8] sm:$0xff] (!%p2114_p12)  ;;  %v1785_v49 = vadd.f32 (!%p2114_p12), %v1781_v42, %v1760_v45 }
 0x2d0   : > { %v1783_v46 = vld [vmem:[#allocation7 + $0x10] sm:$0xff] (!%p2114_p12)  ;;  %v1786_v50 = vadd.f32 (!%p2114_p12), %v1782_v44, %v1762_v40  ;;  %v1784_v52 = vld [vmem:[#allocation7 + $0x18] sm:$0xff] (!%p2114_p12) }
 0x2d1   : > { %v1787_v51 = vadd.f32 (!%p2114_p12), %v1783_v46, %v1764_v47  ;;  %v1788_v53 = vadd.f32 (!%p2114_p12), %v1784_v52, %v1766_v48  ;;  %1789 = vst [vmem:[#allocation7] sm:$0xff] (!%p2114_p12), %v1785_v49 }
 0x2d2   : > { %1790 = vst [vmem:[#allocation7 + $0x8] sm:$0xff] (!%p2114_p12), %v1786_v50 }
 0x2d3   : > { %1791 = vst [vmem:[#allocation7 + $0x10] sm:$0xff] %v1787_v51  ;;  %1792 = vst [vmem:[#allocation7 + $0x18] sm:$0xff] %v1788_v53 }
 0x2d4 PF: > { %p2890_p4 = scmp.eq.s32.totalorder %s1905_s18, 1  ;;  %s2468_s15 = smov [#allocation7]  }
 0x2d5   : > { %s1803_s29 = sshll.u32 %s2468_s15, 4  ;;  %s1804_s29 = int_to_ptr.vmem [resolvable:$true] %s1803_s29 }
 0x2d6   : > { %s2375_s4 = scalar_lea.vmem %s1804_s29, 512  ;;  %p2382_p0 = scmp.lt.s32.totalorder %s1804_s29, %s1804_s29 }
 0x2d7   : > { %p2376_p8 = scmp.ne.s32.totalorder %s1804_s29, %s2375_s4  ;;  %p2383_p10 = scmp.lt.s32.totalorder %s2375_s4, %s2375_s4 }
 0x2d9   : > { %p2377_p2 = pnand %p2376_p8, %p2890_p4  ;;  %p2384_p5 = por %p2383_p10, %p2382_p0 }
 0x2db   : > { %p2378_p3 = pneg %p2377_p2 }
 0x2dd   : > { %p2385_p6 = pnand %p2384_p5, %p2378_p3 }
 0x2df   : > { %2388 = shalt.err (!%p2385_p6)
}
 0x2e0   : > { %s2389_s18 = scalar_lea.hbm %s2937_s3, 512 }
 0x2e1   : > { %p2390_p11 = scmp.ne.s32.totalorder %s2937_s3, %s2389_s18  ;;  %p2395_p7 = scmp.lt.u32.totalorder %s2389_s18, %s2937_s3 }
 0x2e3   : > { %p2391_p13 = pnand %p2390_p11, %p2890_p4 }
 0x2e5   : > { %p2392_p1 = pneg %p2391_p13 }
 0x2e7   : > { %p2397_p9 = pnand %p2395_p7, %p2392_p1 }
 0x2e9   : > { %2400 = shalt.err (!%p2397_p9)
}
 0x2ea   : > { %s2469_s7 = smov 256   ;;  %s2470_s26 = smov 16  }
 0x2eb   : > { %2131 = dma.vmem_to_hbm [thread:$0]  (%p2890_p4), %s1804_s29, 512, %s2937_s3, [#allocation4], %s2469_s7, %s2469_s7, %s2470_s26  }
 0x2ec   : > { %2434 = dma.done.wait (%p2890_p4), [#allocation4], 512  }
 0x2ed   : > { %2436 = vsyncadd (%p2890_p4), [#allocation4], 4294966784 }
 0x2ee PF: > { %s20_s17 = sadd.s32 1, %s2459_s17   ;;  %s2946_s12 = smov %s2443_s13 }
 0x2ef   : > { %p17_p12 = scmp.ge.s32.totalorder %s20_s17, 4   ;;  %s2947_s13 = smov %s2447_s14 }
 0x2f0   : > { %s2948_s14 = smov %s2542_s24  ;;  %s2949_s15 = smov %s2455_s16 }
 0x2f1   : > { %s2950_s16 = smov %s2952_s19  ;;  %19 = sbr.rel (!%p17_p12) target bundleno = 7 (0x7), region = 94 }
 0x2f8   :  { %1819 = vsyncpa [#allocation3], 1 }
 0x2f9   :  { %1821 = vsyncpa [#allocation3 + $0x1], 1 }
 0x2fa   :  { %1822 = vsyncpa [#allocation6], 1 }
 0x2fb   :  { %1824 = vsyncpa [#allocation6 + $0x1], 1 }
 0x2fc   :  { %1825 = vsyncpa [#allocation4], 1 }
 0x2fd   :  { %1827 = vsyncpa [#allocation4 + $0x1], 1 }

</bundles_post_ra>
